<compile_context>
chip_gen: v5e
topology: v5e:2x2
jax: 0.10.0
libtpu: 0.0.40
codegen_flags: <defaults>
</compile_context>

<pallas_src>
import functools

import jax
import jax.numpy as jnp
from jax.experimental import pallas as pl
from jax.experimental.pallas import tpu as pltpu


def _round_up(n, m):
    return ((n + m - 1) // m) * m


def _pick_chunk(total, candidates):
    """Largest candidate that divides `total` (total is a multiple of 128)."""
    for c in candidates:
        if c <= total and total % c == 0:
            return c
    return total


def _vmem_capacity_bytes():
    """Physical VMEM per TensorCore; conservative 64 MiB (v7x) fallback."""
    try:
        info = pltpu.get_tpu_info()
        for attr in ("vmem_capacity_bytes", "vmem_size_bytes", "vmem_bytes"):
            v = getattr(info, attr, None)
            if v:
                return int(v)
    except Exception:
        pass
    return 64 << 20


# ---------------------------------------------------------------------------
# Kernels
# ---------------------------------------------------------------------------
def _ffn_kernel_resident(x_ref, w1_ref, b1_ref, w2_ref, b2_ref, o_ref, acc_ref, *, th):
    """Weights fully VMEM-resident (single-buffered).  The hidden dim is walked in
    chunks of `th` inside the kernel so the live f32 intermediate is (tm, th),
    not (tm, hp)."""
    w_dtype = w1_ref.dtype
    x = x_ref[...].astype(w_dtype)                 # f32 -> bf16 cast in-kernel (VPU)
    hp = w1_ref.shape[1]
    n_chunks = hp // th

    if n_chunks == 1:
        h = jnp.dot(x, w1_ref[...], preferred_element_type=jnp.float32)
        h = jnp.maximum(h + b1_ref[...], 0.0)
        o = jnp.dot(h.astype(w_dtype), w2_ref[...], preferred_element_type=jnp.float32)
        o_ref[...] = (o + b2_ref[...]).astype(o_ref.dtype)
    else:
        acc_ref[...] = jnp.zeros_like(acc_ref)

        @pl.loop(0, n_chunks)
        def _(c):
            off = pl.multiple_of(c * th, th)
            h = jnp.dot(x, w1_ref[:, pl.ds(off, th)],
                        preferred_element_type=jnp.float32)
            h = jnp.maximum(h + b1_ref[:, pl.ds(off, th)], 0.0)
            acc_ref[...] += jnp.dot(h.astype(w_dtype), w2_ref[pl.ds(off, th), :],
                                    preferred_element_type=jnp.float32)

        o_ref[...] = (acc_ref[...] + b2_ref[...]).astype(o_ref.dtype)


def _ffn_kernel_stream(x_ref, w1_ref, b1_ref, w2_ref, b2_ref, o_ref, acc_ref):
    """Hidden dim tiled on the last ("arbitrary") grid axis; weight chunks stream
    through VMEM and a (tm, dp) f32 accumulator persists across the k axis."""
    k = pl.program_id(1)

    @pl.when(k == 0)
    def _():
        acc_ref[...] = jnp.zeros_like(acc_ref)

    w_dtype = w1_ref.dtype
    x = x_ref[...].astype(w_dtype)
    h = jnp.dot(x, w1_ref[...], preferred_element_type=jnp.float32)
    h = jnp.maximum(h + b1_ref[...], 0.0)
    acc_ref[...] += jnp.dot(h.astype(w_dtype), w2_ref[...],
                            preferred_element_type=jnp.float32)

    @pl.when(k == pl.num_programs(1) - 1)
    def _():
        o_ref[...] = (acc_ref[...] + b2_ref[...]).astype(o_ref.dtype)


# ---------------------------------------------------------------------------
# Parameter prep (one time, not per forward)
# ---------------------------------------------------------------------------
def prepare_params(w1, b1, w2, b2, *, compute_dtype=jnp.bfloat16):
    """Transpose (nn.Linear layout -> row-major), zero-pad feature dims to
    multiples of 128 (lane-dense), cast weights to the compute dtype; biases f32."""
    hidden, d_model = w1.shape
    dp = _round_up(d_model, 128)
    hp = _round_up(hidden, 128)
    w1_t = jnp.zeros((dp, hp), compute_dtype).at[:d_model, :hidden].set(
        w1.T.astype(compute_dtype))
    w2_t = jnp.zeros((hp, dp), compute_dtype).at[:hidden, :d_model].set(
        w2.T.astype(compute_dtype))
    b1_p = jnp.zeros((1, hp), jnp.float32).at[0, :hidden].set(b1.astype(jnp.float32))
    b2_p = jnp.zeros((1, dp), jnp.float32).at[0, :d_model].set(b2.astype(jnp.float32))
    return w1_t, b1_p, w2_t, b2_p


# ---------------------------------------------------------------------------
# Forward
# ---------------------------------------------------------------------------
def cnn_forward(x, w1_t, b1_p, w2_t, b2_p, *, tm=None, hidden_chunk=None,
                out_dtype=None, force_streaming=False):
    """x: (B, S, d_model) f32.  Prepared params from prepare_params."""
    B, S, d_model = x.shape
    dp, hp = w1_t.shape
    w_isz = jnp.dtype(w1_t.dtype).itemsize
    x_isz = jnp.dtype(x.dtype).itemsize
    out_dtype = x.dtype if out_dtype is None else out_dtype
    o_isz = jnp.dtype(out_dtype).itemsize
    M = B * S

    vmem_cap = _vmem_capacity_bytes()

    # Row tile: full-MXU-height multiples of 128; bigger tiles on 128-MiB chips.
    if tm is None:
        tm = 512 if vmem_cap >= (100 << 20) else 256
    tm_eff = min(tm, max(128, _round_up(M, 128)))
    n_row_tiles = pl.cdiv(M, tm_eff)

    # Feature padding only when d_model is not lane aligned.  Rows are never padded:
    # the ragged last row tile is handled by the grid (partial block, masked store).
    x2d = x.reshape(M, d_model)
    if dp != d_model:
        x2d = jnp.zeros((M, dp), x.dtype).at[:, :d_model].set(x2d)

    weight_bytes = 2 * dp * hp * w_isz
    bias_bytes = (hp + dp) * 4
    io_bytes = 2 * tm_eff * dp * x_isz + 2 * tm_eff * dp * o_isz  # dbl-buffered x/out

    # Resident-path footprint (Buffered(1) weights + bounded intermediates + slack).
    if hidden_chunk is not None and hp % hidden_chunk == 0:
        th_res = hidden_chunk
    else:
        th_res = hp if hp <= 1024 else _pick_chunk(hp, (1024, 512, 256, 128))
    interm_bytes = tm_eff * th_res * (4 + w_isz) + tm_eff * dp * (4 + w_isz)
    resident_bytes = weight_bytes + bias_bytes + io_bytes + interm_bytes + (2 << 20)

    use_streaming = force_streaming or resident_bytes > int(0.70 * vmem_cap)

    if not use_streaming:
        grid = (n_row_tiles,)
        kernel = functools.partial(_ffn_kernel_resident, th=th_res)
        in_specs = [
            pl.BlockSpec((tm_eff, dp), lambda i: (i, 0)),
            pl.BlockSpec((dp, hp), lambda i: (0, 0), pipeline_mode=pl.Buffered(1)),
            pl.BlockSpec((1, hp), lambda i: (0, 0), pipeline_mode=pl.Buffered(1)),
            pl.BlockSpec((hp, dp), lambda i: (0, 0), pipeline_mode=pl.Buffered(1)),
            pl.BlockSpec((1, dp), lambda i: (0, 0), pipeline_mode=pl.Buffered(1)),
        ]
        out_specs = pl.BlockSpec((tm_eff, dp), lambda i: (i, 0))
        dims = ("parallel",)
        footprint = resident_bytes
        weight_hbm_reads = 1
    else:
        if hidden_chunk is not None and hp % hidden_chunk == 0:
            th = hidden_chunk
        else:
            th = _pick_chunk(hp, (1024, 512, 256, 128))
        grid = (n_row_tiles, hp // th)
        kernel = _ffn_kernel_stream
        in_specs = [
            pl.BlockSpec((tm_eff, dp), lambda i, k: (i, 0)),
            pl.BlockSpec((dp, th), lambda i, k: (0, k)),
            pl.BlockSpec((1, th), lambda i, k: (0, k)),
            pl.BlockSpec((th, dp), lambda i, k: (k, 0)),
            pl.BlockSpec((1, dp), lambda i, k: (0, 0)),
        ]
        out_specs = pl.BlockSpec((tm_eff, dp), lambda i, k: (i, 0))
        dims = ("parallel", "arbitrary")
        footprint = (4 * dp * th * w_isz + bias_bytes + io_bytes
                     + tm_eff * th * (4 + w_isz) + tm_eff * dp * (4 + w_isz) + (2 << 20))
        weight_hbm_reads = n_row_tiles

    # Per-chip VMEM clamp: at least the footprint + headroom, never > ~physical.
    vmem_limit = int(min(0.9 * vmem_cap, max(32 << 20, footprint + (16 << 20))))

    cost = pl.CostEstimate(
        flops=4 * M * dp * hp,
        transcendentals=0,
        bytes_accessed=(M * dp * (x_isz + o_isz)
                        + weight_hbm_reads * weight_bytes + bias_bytes),
    )

    out2d = pl.pallas_call(
        kernel,
        out_shape=jax.ShapeDtypeStruct((M, dp), out_dtype),
        grid_spec=pltpu.PrefetchScalarGridSpec(
            num_scalar_prefetch=0,
            grid=grid,
            in_specs=in_specs,
            out_specs=out_specs,
            scratch_shapes=[pltpu.VMEM((tm_eff, dp), jnp.float32)],
        ),
        compiler_params=pltpu.CompilerParams(
            dimension_semantics=dims,
            vmem_limit_bytes=vmem_limit,
        ),
        cost_estimate=cost,
    )(x2d, w1_t, b1_p, w2_t, b2_p)

    if dp != d_model:
        out2d = out2d[:, :d_model]
    return out2d.reshape(B, S, d_model)


def init_params(key, d_model, hidden_dim):
    """PyTorch nn.Linear default init: U[-1/sqrt(fan_in), +1/sqrt(fan_in)]."""
    k1, k2, k3, k4 = jax.random.split(key, 4)
    bound1 = 1.0 / (d_model ** 0.5)
    bound2 = 1.0 / (hidden_dim ** 0.5)
    w1 = jax.random.uniform(k1, (hidden_dim, d_model), jnp.float32, -bound1, bound1)
    b1 = jax.random.uniform(k2, (hidden_dim,), jnp.float32, -bound1, bound1)
    w2 = jax.random.uniform(k3, (d_model, hidden_dim), jnp.float32, -bound2, bound2)
    b2 = jax.random.uniform(k4, (d_model,), jnp.float32, -bound2, bound2)
    return w1, b1, w2, b2


if __name__ == "__main__":
    key = jax.random.PRNGKey(0)
    batch, seq, d_model, hidden_dim = 2, 8, 32, 64

    kx, kp = jax.random.split(key)
    x = jax.random.normal(kx, (batch, seq, d_model), jnp.float32)
    w1, b1, w2, b2 = init_params(kp, d_model, hidden_dim)
    params = prepare_params(w1, b1, w2, b2)            # transpose/pad/cast once

    def ref_bf16(xx, a1, c1, a2, c2):
        """Reference mirroring the kernel's bf16-matmul / f32-accumulate math."""
        xb = xx.astype(jnp.bfloat16)
        h = jnp.dot(xb, a1.T.astype(jnp.bfloat16),
                    preferred_element_type=jnp.float32) + c1
        h = jnp.maximum(h, 0.0)
        return jnp.dot(h.astype(jnp.bfloat16), a2.T.astype(jnp.bfloat16),
                       preferred_element_type=jnp.float32) + c2

    # 1) Default path: VMEM-resident weights, single hidden chunk.
    out = jax.block_until_ready(cnn_forward(x, *params))
    assert out.shape == (batch, seq, d_model)
    assert jnp.allclose(out, ref_bf16(x, w1, b1, w2, b2), atol=2e-2, rtol=2e-2)
    ref_f32 = jnp.maximum(x @ w1.T + b1, 0.0) @ w2.T + b2
    assert jnp.allclose(out, ref_f32, atol=1e-1, rtol=1e-1)   # loose f32 contract

    # 2) Resident path with in-kernel hidden chunking (pl.loop branch).
    w1b, b1b, w2b, b2b = init_params(jax.random.PRNGKey(1), d_model, 256)
    params_b = prepare_params(w1b, b1b, w2b, b2b)
    out_b = jax.block_until_ready(cnn_forward(x, *params_b, hidden_chunk=128))
    assert jnp.allclose(out_b, ref_bf16(x, w1b, b1b, w2b, b2b), atol=2e-2, rtol=2e-2)

    # 3) Streaming path: hidden dim on the grid, accumulator scratch across k.
    out_c = jax.block_until_ready(
        cnn_forward(x, *params_b, hidden_chunk=128, force_streaming=True))
    assert jnp.allclose(out_c, ref_bf16(x, w1b, b1b, w2b, b2b), atol=2e-2, rtol=2e-2)

    # 4) Ragged row count across multiple row tiles (no row padding, partial tail tile).
    xd = jax.random.normal(jax.random.PRNGKey(2), (4, 80, d_model), jnp.float32)
    out_d = jax.block_until_ready(cnn_forward(xd, *params, tm=128))
    assert out_d.shape == (4, 80, d_model)
    assert jnp.allclose(out_d, ref_bf16(xd, w1, b1, w2, b2), atol=2e-2, rtol=2e-2)

    print("KERNEL_OK")
</pallas_src>

<mosaic_0001>
module attributes {stable_mosaic.version = 11 : i64} {
  func.func @_ffn_kernel_resident(%arg0: i32, %arg1: memref<128x128xf32, #tpu.memory_space<vmem>>, %arg2: memref<128x128xbf16, #tpu.memory_space<vmem>>, %arg3: memref<1x128xf32, #tpu.memory_space<vmem>>, %arg4: memref<128x128xbf16, #tpu.memory_space<vmem>>, %arg5: memref<1x128xf32, #tpu.memory_space<vmem>>, %arg6: memref<128x128xf32, #tpu.memory_space<vmem>>, %arg7: memref<128x128xf32, #tpu.memory_space<vmem>>) attributes {dimension_semantics = [#tpu.dimension_semantics<parallel>], iteration_bounds = array<i64: 1>, scalar_prefetch = 0 : i64, scratch_operands = 1 : i64, tpu.core_type = #tpu.core_type<tc>, window_params = [{transform_indices = @transform_0, window_bounds = array<i64: 128, 128>}, {pipeline_mode = #tpu.pipeline_mode<synchronous>, transform_indices = @transform_1, window_bounds = array<i64: 128, 128>}, {pipeline_mode = #tpu.pipeline_mode<synchronous>, transform_indices = @transform_2, window_bounds = array<i64: 1, 128>}, {pipeline_mode = #tpu.pipeline_mode<synchronous>, transform_indices = @transform_3, window_bounds = array<i64: 128, 128>}, {pipeline_mode = #tpu.pipeline_mode<synchronous>, transform_indices = @transform_4, window_bounds = array<i64: 1, 128>}, {transform_indices = @transform_5, window_bounds = array<i64: 128, 128>}]} {
    %c0 = arith.constant 0 : index
    %c0_0 = arith.constant 0 : index
    %0 = vector.load %arg1[%c0, %c0_0] : memref<128x128xf32, #tpu.memory_space<vmem>>, vector<128x128xf32>
    %1 = arith.truncf %0 : vector<128x128xf32> to vector<128x128xbf16>
    %c0_1 = arith.constant 0 : index
    %c0_2 = arith.constant 0 : index
    %2 = vector.load %arg2[%c0_1, %c0_2] : memref<128x128xbf16, #tpu.memory_space<vmem>>, vector<128x128xbf16>
    %cst = arith.constant dense<0.000000e+00> : vector<128x128xf32>
    %3 = tpu.matmul %1, %2, %cst {dimension_numbers = #tpu.dot_dimension_numbers<[1], [0], [0], [1], [0, 0, 1, 1], [], []>} : vector<128x128xbf16>, vector<128x128xbf16>, vector<128x128xf32> -> vector<128x128xf32>
    %c0_3 = arith.constant 0 : index
    %c0_4 = arith.constant 0 : index
    %4 = vector.load %arg3[%c0_3, %c0_4] : memref<1x128xf32, #tpu.memory_space<vmem>>, vector<1x128xf32>
    %5 = vector.broadcast %4 : vector<1x128xf32> to vector<128x128xf32>
    %6 = arith.addf %3, %5 : vector<128x128xf32>
    %cst_5 = arith.constant 0.000000e+00 : f32
    %7 = vector.broadcast %cst_5 : f32 to vector<128x128xf32>
    %8 = arith.maximumf %6, %7 : vector<128x128xf32>
    %9 = arith.truncf %8 : vector<128x128xf32> to vector<128x128xbf16>
    %c0_6 = arith.constant 0 : index
    %c0_7 = arith.constant 0 : index
    %10 = vector.load %arg4[%c0_6, %c0_7] : memref<128x128xbf16, #tpu.memory_space<vmem>>, vector<128x128xbf16>
    %cst_8 = arith.constant dense<0.000000e+00> : vector<128x128xf32>
    %11 = tpu.matmul %9, %10, %cst_8 {dimension_numbers = #tpu.dot_dimension_numbers<[1], [0], [0], [1], [0, 0, 1, 1], [], []>} : vector<128x128xbf16>, vector<128x128xbf16>, vector<128x128xf32> -> vector<128x128xf32>
    %c0_9 = arith.constant 0 : index
    %c0_10 = arith.constant 0 : index
    %12 = vector.load %arg5[%c0_9, %c0_10] : memref<1x128xf32, #tpu.memory_space<vmem>>, vector<1x128xf32>
    %13 = vector.broadcast %12 : vector<1x128xf32> to vector<128x128xf32>
    %14 = arith.addf %11, %13 : vector<128x128xf32>
    %c0_11 = arith.constant 0 : index
    %c0_12 = arith.constant 0 : index
    %15 = vector.load %arg6[%c0_11, %c0_12] : memref<128x128xf32, #tpu.memory_space<vmem>>, vector<128x128xf32>
    tpu.vector_store %arg6[%c0_11, %c0_12], %14 {strides = array<i32>} : memref<128x128xf32, #tpu.memory_space<vmem>>, vector<128x128xf32>,
    return
  }
  func.func @transform_0(%arg0: i32) -> (i32, i32) {
    %c0_i32 = arith.constant 0 : i32
    %c0_i32_0 = arith.constant 0 : i32
    return %arg0, %c0_i32 : i32, i32
  }
  func.func @transform_1(%arg0: i32) -> (i32, i32) {
    %c0_i32 = arith.constant 0 : i32
    %c0_i32_0 = arith.constant 0 : i32
    %c0_i32_1 = arith.constant 0 : i32
    return %c0_i32, %c0_i32_0 : i32, i32
  }
  func.func @transform_2(%arg0: i32) -> (i32, i32) {
    %c0_i32 = arith.constant 0 : i32
    %c0_i32_0 = arith.constant 0 : i32
    %c0_i32_1 = arith.constant 0 : i32
    return %c0_i32, %c0_i32_0 : i32, i32
  }
  func.func @transform_3(%arg0: i32) -> (i32, i32) {
    %c0_i32 = arith.constant 0 : i32
    %c0_i32_0 = arith.constant 0 : i32
    %c0_i32_1 = arith.constant 0 : i32
    return %c0_i32, %c0_i32_0 : i32, i32
  }
  func.func @transform_4(%arg0: i32) -> (i32, i32) {
    %c0_i32 = arith.constant 0 : i32
    %c0_i32_0 = arith.constant 0 : i32
    %c0_i32_1 = arith.constant 0 : i32
    return %c0_i32, %c0_i32_0 : i32, i32
  }
  func.func @transform_5(%arg0: i32) -> (i32, i32) {
    %c0_i32 = arith.constant 0 : i32
    %c0_i32_0 = arith.constant 0 : i32
    return %arg0, %c0_i32 : i32, i32
  }
}

</mosaic_0001>

<bundles_post_ra>
// kernel: tpu_custom_call.1
= control target key start
LH: loop header
LB: loop body
LE: loop exit
PB: predicated region body
PF: predicated region fallthrough
CT: control target
= control target key end

     0   :  { %10 = vsyncpa [#allocation4], 0  ;;  %s656_s0 = inlined_call_operand.hbm [shape: f32[16,128], index: 0, kind: input, shape index: {}]   ;;  %s657_s1 = inlined_call_operand.hbm [shape: bf16[128,128], index: 1, kind: input, shape index: {}]   ;;  %s658_s2 = inlined_call_operand.vmem [shape: f32[1,128], index: 2, kind: input, shape index: {}]   ;;  %s659_s3 = inlined_call_operand.hbm [shape: bf16[128,128], index: 3, kind: input, shape index: {}]   ;;  %s660_s4 = inlined_call_operand.vmem [shape: f32[1,128], index: 4, kind: input, shape index: {}]   ;;  %s661_s5 = inlined_call_operand.hbm [shape: f32[16,128], index: 5, kind: output, shape index: {}]  }
   0x1   :  { %11 = vsyncpa [#allocation7], 0 }
   0x2   :  { %12 = vsyncpa [#allocation5], 0  ;;  %s30_s20 = sshll.u32 %s657_s1, 4  ;;  %s31_s20 = int_to_ptr.hbm [resolvable:$true] %s30_s20 }
   0x3   :  { %16 = vsyncadd [#allocation4], 1792  ;;  %s594_s21 = smov [#allocation6]   ;;  %s17_s25 = sshll.u32 %s656_s0, 4  ;;  %s18_s25 = int_to_ptr.hbm [resolvable:$true] %s17_s25 }
   0x4   :  { %s32_s22 = sshll.u32 %s594_s21, 4  ;;  %s595_s26 = smov 64   ;;  %s33_s22 = int_to_ptr.vmem [resolvable:$true] %s32_s22 }
   0x5   :  { %s596_s27 = smov 4   ;;  %s597_s28 = smov [#allocation3]  }
   0x6   :  { %38 = dma.hbm_to_vmem [thread:$0]  %s31_s20, 1024, %s33_s22, [#allocation7], %s595_s26, %s595_s26, %s596_s27  }
   0x7   :  { %s19_s29 = sshll.u32 %s597_s28, 4  ;;  %s598_s30 = smov 128   ;;  %s20_s29 = int_to_ptr.vmem [resolvable:$true] %s19_s29 }
   0x8   :  { %s599_s6 = smov 8   ;;  %s45_s8 = sshll.u32 %s659_s3, 4  ;;  %s46_s8 = int_to_ptr.hbm [resolvable:$true] %s45_s8 }
   0x9   :  { %25 = dma.hbm_to_vmem [thread:$0]  %s18_s25, 256, %s20_s29, [#allocation4], %s598_s30, %s598_s30, %s599_s6  }
   0xa   :  { %s600_s9 = smov [#allocation8]  }
   0xb   :  { %s47_s0 = sshll.u32 %s600_s9, 4  ;;  %s48_s0 = int_to_ptr.vmem [resolvable:$true] %s47_s0 }
   0xc   :  { %53 = dma.hbm_to_vmem [thread:$0]  %s46_s8, 1024, %s48_s0, [#allocation7], %s595_s26, %s595_s26, %s596_s27  }
   0xd   :  { %588 = dma.done.wait [#allocation4], 2048  }
   0xe   :  { %589 = vsyncadd [#allocation4], 4294965248 }
   0xf   :  { %590 = dma.done.wait [#allocation7], 2048  }
  0x10   :  { %591 = vsyncadd [#allocation7], 4294965248  ;;  %v457_v0 = vld [vmem:[#allocation6 + $0x38] sm:$0xff]  ;;  %v456_v1 = vld [vmem:[#allocation6 + $0x30] sm:$0xff] }
  0x11   :  { %160 = vmatpush.bf16.msra.mxu0 %v457_v0  ;;  %466 = vmatpush.bf16.msra.mxu2 %v457_v0  ;;  %v455_v2 = vld [vmem:[#allocation6 + $0x28] sm:$0xff]  ;;  %v454_v3 = vld [vmem:[#allocation6 + $0x20] sm:$0xff]  ;;  %v453_v4 = vld [vmem:[#allocation6 + $0x18] sm:$0xff] }
  0x12   :  { %v452_v5 = vld [vmem:[#allocation6 + $0x10] sm:$0xff]  ;;  %v451_v6 = vld [vmem:[#allocation6 + $0x8] sm:$0xff]  ;;  %v450_v7 = vld [vmem:[#allocation6] sm:$0xff] }
  0x13   :  { %v68_v8 = vld [vmem:[#allocation3] sm:$0xff]  ;;  %v69_v9 = vld [vmem:[#allocation3 + $0x8] sm:$0xff]  ;;  %v70_v14 = vld [vmem:[#allocation3 + $0x10] sm:$0xff] }
  0x14   :  { %v76_v10 = vld [vmem:[#allocation3 + $0x40] sm:$0xff]  ;;  %v77_v11 = vld [vmem:[#allocation3 + $0x48] sm:$0xff]  ;;  %v84_v12 = vpack.c.bf16 %v69_v9, %v68_v8  ;;  %v71_v15 = vld [vmem:[#allocation3 + $0x18] sm:$0xff] }
  0x15   :  { %161 = vmatpush.bf16.msra.mxu0 %v456_v1  ;;  %467 = vmatpush.bf16.msra.mxu2 %v456_v1  ;;  %v88_v13 = vpack.c.bf16 %v77_v11, %v76_v10  ;;  %v78_v16 = vld [vmem:[#allocation3 + $0x50] sm:$0xff]  ;;  %v79_v17 = vld [vmem:[#allocation3 + $0x58] sm:$0xff]  ;;  %v85_v18 = vpack.c.bf16 %v71_v15, %v70_v14  ;;  %v463_v22 = vld [vmem:[#allocation8 + $0x28] sm:$0xff] }
  0x16   :  { %v89_v19 = vpack.c.bf16 %v79_v17, %v78_v16  ;;  %v465_v20 = vld [vmem:[#allocation8 + $0x38] sm:$0xff]  ;;  %v464_v21 = vld [vmem:[#allocation8 + $0x30] sm:$0xff]  ;;  %v72_v23 = vld [vmem:[#allocation3 + $0x20] sm:$0xff] }
  0x17   :  { %301 = vmatpush.bf16.msra.mxu1 %v465_v20  ;;  %474 = vmatpush.bf16.msra.mxu3 %v465_v20  ;;  %v73_v24 = vld [vmem:[#allocation3 + $0x28] sm:$0xff]  ;;  %v80_v25 = vld [vmem:[#allocation3 + $0x60] sm:$0xff]  ;;  %v74_v30 = vld [vmem:[#allocation3 + $0x30] sm:$0xff] }
  0x18   :  { %v81_v26 = vld [vmem:[#allocation3 + $0x68] sm:$0xff]  ;;  %v462_v27 = vld [vmem:[#allocation8 + $0x20] sm:$0xff]  ;;  %v86_v28 = vpack.c.bf16 %v73_v24, %v72_v23  ;;  %v75_v31 = vld [vmem:[#allocation3 + $0x38] sm:$0xff] }
  0x19   :  { %162 = vmatpush.bf16.msra.mxu0 %v455_v2  ;;  %468 = vmatpush.bf16.msra.mxu2 %v455_v2  ;;  %v90_v29 = vpack.c.bf16 %v81_v26, %v80_v25  ;;  %v82_v32 = vld [vmem:[#allocation3 + $0x70] sm:$0xff]  ;;  %v83_v33 = vld [vmem:[#allocation3 + $0x78] sm:$0xff]  ;;  %v87_v34 = vpack.c.bf16 %v75_v31, %v74_v30  ;;  %v459_v38 = vld [vmem:[#allocation8 + $0x8] sm:$0xff] }
  0x1a   :  { %v91_v35 = vpack.c.bf16 %v83_v33, %v82_v32  ;;  %v461_v36 = vld [vmem:[#allocation8 + $0x18] sm:$0xff]  ;;  %v460_v37 = vld [vmem:[#allocation8 + $0x10] sm:$0xff]  ;;  %v458_v39 = vld [vmem:[#allocation8] sm:$0xff] }
  0x1b   :  { %302 = vmatpush.bf16.msra.mxu1 %v464_v21  ;;  %475 = vmatpush.bf16.msra.mxu3 %v464_v21  ;;  %v490_v41 = vld [vmem:[%s658_s2] ss:$0 sm:$0xff] }
  0x1c   :  { %v491_v33 = vld [vmem:[%s660_s4] ss:$0 sm:$0xff] }
  0x1d   :  { %163 = vmatpush.bf16.msra.mxu0 %v454_v3  ;;  %469 = vmatpush.bf16.msra.mxu2 %v454_v3 }
  0x1f   :  { %303 = vmatpush.bf16.msra.mxu1 %v463_v22  ;;  %476 = vmatpush.bf16.msra.mxu3 %v463_v22 }
  0x21   :  { %164 = vmatpush.bf16.msra.mxu0 %v453_v4  ;;  %470 = vmatpush.bf16.msra.mxu2 %v453_v4 }
  0x23   :  { %304 = vmatpush.bf16.msra.mxu1 %v462_v27  ;;  %477 = vmatpush.bf16.msra.mxu3 %v462_v27 }
  0x25   :  { %165 = vmatpush.bf16.msra.mxu0 %v452_v5  ;;  %471 = vmatpush.bf16.msra.mxu2 %v452_v5 }
  0x27   :  { %305 = vmatpush.bf16.msra.mxu1 %v461_v36  ;;  %478 = vmatpush.bf16.msra.mxu3 %v461_v36 }
  0x29   :  { %166 = vmatpush.bf16.msra.mxu0 %v451_v6  ;;  %472 = vmatpush.bf16.msra.mxu2 %v451_v6 }
  0x2b   :  { %306 = vmatpush.bf16.msra.mxu1 %v460_v37  ;;  %479 = vmatpush.bf16.msra.mxu3 %v460_v37 }
  0x2d   :  { %167 = vmatpush.bf16.msra.mxu0 %v450_v7  ;;  %473 = vmatpush.bf16.msra.mxu2 %v450_v7 }
  0x2f   :  { %307 = vmatpush.bf16.msra.mxu1 %v459_v38  ;;  %480 = vmatpush.bf16.msra.mxu3 %v459_v38 }
  0x30   :  { %168 = vmatmul.bf16.vlgmr.msra.gmra.mxu0 %v84_v12  ;;  %188 = vmatmul.bf16.vlgmr.msra.gmra.mxu2 %v88_v13 }
  0x33   :  { %308 = vmatpush.bf16.msra.mxu1 %v458_v39  ;;  %481 = vmatpush.bf16.msra.mxu3 %v458_v39 }
  0x40   :  { %173 = vmatmul.bf16.gmra.mxu0 %v85_v18  ;;  %193 = vmatmul.bf16.gmra.mxu2 %v89_v19 }
  0x50   :  { %178 = vmatmul.bf16.gmra.mxu0 %v86_v28  ;;  %198 = vmatmul.bf16.gmra.mxu2 %v90_v29 }
  0x60   :  { %183 = vmatmul.bf16.gmra.mxu0 %v87_v34  ;;  %203 = vmatmul.bf16.gmra.mxu2 %v91_v35 }
  0xad   :  { %v169_v40 = vpop.f32.mrf.mxu0 }
  0xae   :  { %v170_v42 = vadd.f32 %v490_v41, %v169_v40 }
  0xb0   :  { %v209_v45 = vmax.f32 %v170_v42, 0.0 }
  0xb3   :  { %v189_v43 = vpop.f32.mrf.mxu2 }
  0xb4   :  { %v190_v48 = vadd.f32 %v490_v41, %v189_v43 }
  0xb5   :  { %v171_v44 = vpop.f32.mrf.mxu0 }
  0xb6   :  { %v172_v46 = vadd.f32 %v490_v41, %v171_v44  ;;  %v217_v53 = vmax.f32 %v190_v48, 0.0 }
  0xb8   :  { %v210_v47 = vmax.f32 %v172_v46, 0.0 }
  0xba   :  { %v225_v49 = vpack.c.bf16 %v210_v47, %v209_v45 }
  0xbb   :  { %v191_v50 = vpop.f32.mrf.mxu2 }
  0xbc   :  { %v192_v51 = vadd.f32 %v490_v41, %v191_v50  ;;  %309 = vmatmul.bf16.vlgmr.msra.gmra.mxu1 %v225_v49 }
  0xbd   :  { %v174_v52 = vpop.f32.mrf.mxu0 }
  0xbe   :  { %v218_v54 = vmax.f32 %v192_v51, 0.0  ;;  %v175_v56 = vadd.f32 %v490_v41, %v174_v52 }
  0xc0   :  { %v229_v55 = vpack.c.bf16 %v218_v54, %v217_v53  ;;  %v211_v59 = vmax.f32 %v175_v56, 0.0 }
  0xc2   :  { %329 = vmatmul.bf16.vlgmr.msra.gmra.mxu3 %v229_v55 }
  0xc3   :  { %v194_v57 = vpop.f32.mrf.mxu2 }
  0xc4   :  { %v195_v62 = vadd.f32 %v490_v41, %v194_v57 }
  0xc5   :  { %v176_v58 = vpop.f32.mrf.mxu0 }
  0xc6   :  { %v177_v60 = vadd.f32 %v490_v41, %v176_v58  ;;  %v219_v3 = vmax.f32 %v195_v62, 0.0 }
  0xc8   :  { %v212_v61 = vmax.f32 %v177_v60, 0.0 }
  0xca   :  { %v226_v63 = vpack.c.bf16 %v212_v61, %v211_v59 }
  0xcb   :  { %v196_v0 = vpop.f32.mrf.mxu2 }
  0xcc   :  { %v197_v1 = vadd.f32 %v490_v41, %v196_v0  ;;  %314 = vmatmul.bf16.gmra.mxu1 %v226_v63 }
  0xcd   :  { %v179_v2 = vpop.f32.mrf.mxu0 }
  0xce   :  { %v220_v4 = vmax.f32 %v197_v1, 0.0  ;;  %v180_v6 = vadd.f32 %v490_v41, %v179_v2 }
  0xd0   :  { %v230_v5 = vpack.c.bf16 %v220_v4, %v219_v3  ;;  %v213_v9 = vmax.f32 %v180_v6, 0.0 }
  0xd2   :  { %334 = vmatmul.bf16.gmra.mxu3 %v230_v5 }
  0xd3   :  { %v199_v7 = vpop.f32.mrf.mxu2 }
  0xd4   :  { %v200_v12 = vadd.f32 %v490_v41, %v199_v7 }
  0xd5   :  { %v181_v8 = vpop.f32.mrf.mxu0 }
  0xd6   :  { %v182_v10 = vadd.f32 %v490_v41, %v181_v8  ;;  %v221_v17 = vmax.f32 %v200_v12, 0.0 }
  0xd8   :  { %v214_v11 = vmax.f32 %v182_v10, 0.0 }
  0xda   :  { %v227_v13 = vpack.c.bf16 %v214_v11, %v213_v9 }
  0xdb   :  { %v201_v14 = vpop.f32.mrf.mxu2 }
  0xdc   :  { %v202_v15 = vadd.f32 %v490_v41, %v201_v14  ;;  %319 = vmatmul.bf16.gmra.mxu1 %v227_v13 }
  0xdd   :  { %v184_v16 = vpop.f32.mrf.mxu0 }
  0xde   :  { %v222_v18 = vmax.f32 %v202_v15, 0.0  ;;  %v185_v20 = vadd.f32 %v490_v41, %v184_v16 }
  0xe0   :  { %v231_v19 = vpack.c.bf16 %v222_v18, %v221_v17  ;;  %v215_v23 = vmax.f32 %v185_v20, 0.0 }
  0xe2   :  { %339 = vmatmul.bf16.gmra.mxu3 %v231_v19 }
  0xe3   :  { %v204_v21 = vpop.f32.mrf.mxu2 }
  0xe4   :  { %v205_v26 = vadd.f32 %v490_v41, %v204_v21 }
  0xe5   :  { %v186_v22 = vpop.f32.mrf.mxu0 }
  0xe6   :  { %v187_v24 = vadd.f32 %v490_v41, %v186_v22  ;;  %v223_v30 = vmax.f32 %v205_v26, 0.0 }
  0xe8   :  { %v216_v25 = vmax.f32 %v187_v24, 0.0 }
  0xea   :  { %v228_v27 = vpack.c.bf16 %v216_v25, %v215_v23 }
  0xeb   :  { %v206_v28 = vpop.f32.mrf.mxu2 }
  0xec   :  { %v207_v29 = vadd.f32 %v490_v41, %v206_v28  ;;  %324 = vmatmul.bf16.gmra.mxu1 %v228_v27 }
  0xee   :  { %v224_v31 = vmax.f32 %v207_v29, 0.0 }
  0xf0   :  { %v232_v32 = vpack.c.bf16 %v224_v31, %v223_v30 }
  0xf2   :  { %344 = vmatmul.bf16.gmra.mxu3 %v232_v32 }
 0x139   :  { %v310_v34 = vpop.f32.mrf.mxu1 }
 0x13a   :  { %v311_v35 = vadd.f32 %v491_v33, %v310_v34 }
 0x13c   :  { %350 = vst [vmem:[#allocation9] sm:$0xff] %v311_v35 }
 0x141   :  { %v312_v36 = vpop.f32.mrf.mxu1 }
 0x142   :  { %v313_v37 = vadd.f32 %v491_v33, %v312_v36 }
 0x144   :  { %351 = vst [vmem:[#allocation9 + $0x8] sm:$0xff] %v313_v37 }
 0x145   :  { %v330_v38 = vpop.f32.mrf.mxu3 }
 0x146   :  { %v331_v39 = vadd.f32 %v491_v33, %v330_v38 }
 0x148   :  { %358 = vst [vmem:[#allocation9 + $0x40] sm:$0xff] %v331_v39 }
 0x149   :  { %v315_v40 = vpop.f32.mrf.mxu1 }
 0x14a   :  { %v316_v41 = vadd.f32 %v491_v33, %v315_v40 }
 0x14c   :  { %352 = vst [vmem:[#allocation9 + $0x10] sm:$0xff] %v316_v41 }
 0x14d   :  { %v332_v42 = vpop.f32.mrf.mxu3 }
 0x14e   :  { %v333_v43 = vadd.f32 %v491_v33, %v332_v42 }
 0x150   :  { %359 = vst [vmem:[#allocation9 + $0x48] sm:$0xff] %v333_v43 }
 0x151   :  { %v317_v44 = vpop.f32.mrf.mxu1 }
 0x152   :  { %v318_v45 = vadd.f32 %v491_v33, %v317_v44 }
 0x154   :  { %353 = vst [vmem:[#allocation9 + $0x18] sm:$0xff] %v318_v45 }
 0x155   :  { %v335_v46 = vpop.f32.mrf.mxu3 }
 0x156   :  { %v336_v47 = vadd.f32 %v491_v33, %v335_v46 }
 0x158   :  { %360 = vst [vmem:[#allocation9 + $0x50] sm:$0xff] %v336_v47 }
 0x159   :  { %v320_v48 = vpop.f32.mrf.mxu1 }
 0x15a   :  { %v321_v49 = vadd.f32 %v491_v33, %v320_v48 }
 0x15c   :  { %354 = vst [vmem:[#allocation9 + $0x20] sm:$0xff] %v321_v49 }
 0x15d   :  { %v337_v50 = vpop.f32.mrf.mxu3 }
 0x15e   :  { %v338_v51 = vadd.f32 %v491_v33, %v337_v50 }
 0x160   :  { %361 = vst [vmem:[#allocation9 + $0x58] sm:$0xff] %v338_v51 }
 0x161   :  { %v322_v52 = vpop.f32.mrf.mxu1 }
 0x162   :  { %v323_v53 = vadd.f32 %v491_v33, %v322_v52 }
 0x164   :  { %355 = vst [vmem:[#allocation9 + $0x28] sm:$0xff] %v323_v53 }
 0x165   :  { %v340_v54 = vpop.f32.mrf.mxu3 }
 0x166   :  { %v341_v55 = vadd.f32 %v491_v33, %v340_v54 }
 0x168   :  { %362 = vst [vmem:[#allocation9 + $0x60] sm:$0xff] %v341_v55 }
 0x169   :  { %v325_v56 = vpop.f32.mrf.mxu1 }
 0x16a   :  { %v326_v57 = vadd.f32 %v491_v33, %v325_v56 }
 0x16c   :  { %356 = vst [vmem:[#allocation9 + $0x30] sm:$0xff] %v326_v57 }
 0x16d   :  { %v342_v58 = vpop.f32.mrf.mxu3 }
 0x16e   :  { %v343_v59 = vadd.f32 %v491_v33, %v342_v58 }
 0x170   :  { %363 = vst [vmem:[#allocation9 + $0x68] sm:$0xff] %v343_v59 }
 0x171   :  { %v327_v60 = vpop.f32.mrf.mxu1 }
 0x172   :  { %v328_v61 = vadd.f32 %v491_v33, %v327_v60 }
 0x174   :  { %357 = vst [vmem:[#allocation9 + $0x38] sm:$0xff] %v328_v61 }
 0x175   :  { %v345_v62 = vpop.f32.mrf.mxu3 }
 0x176   :  { %v346_v63 = vadd.f32 %v491_v33, %v345_v62 }
 0x178   :  { %364 = vst [vmem:[#allocation9 + $0x70] sm:$0xff] %v346_v63 }
 0x17d   :  { %v347_v0 = vpop.f32.mrf.mxu3 }
 0x17e   :  { %v348_v1 = vadd.f32 %v491_v33, %v347_v0 }
 0x180   :  { %365 = vst [vmem:[#allocation9 + $0x78] sm:$0xff] %v348_v1 }
 0x181   :  { %369 = vsyncadd [#allocation5], 1792  ;;  %s372_s13 = sshll.u32 %s661_s5, 4  ;;  %s601_s14 = smov [#allocation9]   ;;  %s373_s13 = int_to_ptr.hbm [resolvable:$true] %s372_s13 }
 0x182   :  { %s370_s15 = sshll.u32 %s601_s14, 4  ;;  %s371_s15 = int_to_ptr.vmem [resolvable:$true] %s370_s15 }
 0x183   :  { %378 = dma.vmem_to_hbm [thread:$0]  %s371_s15, 256, %s373_s13, [#allocation5], %s598_s30, %s598_s30, %s599_s6  }
 0x184   :  { %592 = dma.done.wait [#allocation5], 2048  }
 0x185   :  { %593 = vsyncadd [#allocation5], 4294965248 }
 0x186   :  { %383 = vsyncpa [#allocation4], 1 }
 0x187   :  { %384 = vsyncpa [#allocation7], 1 }
 0x188   :  { %385 = vsyncpa [#allocation5], 1 }

</bundles_post_ra>
